<compile_context>
chip_gen: v7x
topology: tpu7x:2x2x1
jax: 0.10.0
libtpu: 0.0.40
codegen_flags: <defaults>
</compile_context>

<pallas_src>
import jax
import jax.numpy as jnp
from jax.experimental import pallas as pl
from jax.experimental.pallas import tpu as pltpu


def _round_up(x, m):
    return ((x + m - 1) // m) * m


def _pick_thw(hw_128, c_in, c_out, n_batch, target_thw):
    """Pixel-tile width: a multiple of 128 that divides the lane-padded pixel count
    exactly (no over-pad), as large as the VMEM budget / target allows, while keeping
    enough total grid steps for DMA prefetch/writeback overlap."""
    num_blocks = hw_128 // 128
    dtype_bytes = 4
    # Double-buffered input tile + double-buffered per-task output tiles per 128 pixels
    # (weights/bias are KiB-scale and ignored).
    per_block_bytes = 2 * dtype_bytes * (c_in + c_out) * 128
    vmem_budget = 12 * 1024 * 1024     # safe under v5e's 16 MiB default scoped VMEM
    max_blocks = max(1, min(vmem_budget // per_block_bytes, max(1, target_thw // 128)))

    divisors = sorted({d for i in range(1, int(num_blocks ** 0.5) + 1)
                       if num_blocks % i == 0 for d in (i, num_blocks // i)})
    candidates = [d for d in divisors if d <= max_blocks]
    best = candidates[-1]                      # biggest tile within budget/target
    for d in reversed(candidates):             # prefer >= ~4 total steps when possible
        if n_batch * (num_blocks // d) >= 4:
            best = d
            break
    return 128 * best


def _make_heads_kernel(num_tasks):
    def kernel(x_ref, *refs):
        # refs layout: w_0, b_0, w_1, b_1, ..., then one output ref per task.
        wb_refs = refs[:2 * num_tasks]
        o_refs = refs[2 * num_tasks:]
        x = x_ref[0]                                   # (C_in, thw), pixels on lanes
        for t in range(num_tasks):
            w_ref = wb_refs[2 * t]                     # (n_cls_t, C_in)
            b_ref = wb_refs[2 * t + 1]                 # (n_cls_t, 1)
            # Tiny contraction; the kernel is DMA-bound, so MXU vs VPU is irrelevant
            # for wall-clock.  For C_in >= 64 with tight tolerances, consider
            # precision=jax.lax.Precision.HIGHEST.
            y = jnp.dot(w_ref[...], x, preferred_element_type=jnp.float32)
            o_refs[t][0] = (y + b_ref[...]).astype(o_refs[t].dtype)
    return kernel


def joint_segmentation_heads(feature_maps, task_params, *, target_thw=65536):
    """Apply all per-task 1x1-conv heads in one fused Pallas pass.

    feature_maps: (N, C_in, H, W) decoder output, NCHW (PyTorch layout).
    task_params:  dict task_name -> (weight (num_classes, C_in, 1, 1), bias (num_classes,))
    Returns:      dict task_name -> logits (N, num_classes, H, W).
    """
    N, C_in, H, W = feature_maps.shape
    names = list(task_params.keys())
    n_cls = [int(task_params[k][0].shape[0]) for k in names]
    C_out = sum(n_cls)
    num_tasks = len(names)

    HW = H * W
    x = feature_maps.reshape(N, C_in, HW)   # free reshape: NCHW is already (channels, pixels)

    # Lane alignment only (<= 127 extra pixels); NOT padded up to a full tile.
    HW_128 = _round_up(HW, 128)
    if HW_128 != HW:
        x = jnp.pad(x, ((0, 0), (0, 0), (0, HW_128 - HW)))

    thw = _pick_thw(HW_128, C_in, C_out, N, target_thw)
    grid = (N, HW_128 // thw)

    # Inputs: the shared feature-map tile, then per-task (weight, bias).
    in_specs = [pl.BlockSpec((1, C_in, thw), lambda n, j: (n, 0, j))]
    inputs = [x]
    for name, k in zip(names, n_cls):
        w, b = task_params[name]
        inputs.append(w.reshape(k, C_in))                              # (n_cls_k, C_in)
        inputs.append(b.reshape(k, 1))                                 # (n_cls_k, 1)
        in_specs.append(pl.BlockSpec((k, C_in), lambda n, j: (0, 0)))  # VMEM-resident
        in_specs.append(pl.BlockSpec((k, 1), lambda n, j: (0, 0)))

    # Per-task outputs emitted directly by the kernel (no fused tensor + XLA slicing).
    out_shape = tuple(jax.ShapeDtypeStruct((N, k, HW_128), feature_maps.dtype)
                      for k in n_cls)
    out_specs = [pl.BlockSpec((1, k, thw), lambda n, j: (n, 0, j)) for k in n_cls]

    cost = pl.CostEstimate(
        flops=2 * N * HW * C_in * C_out,
        transcendentals=0,
        bytes_accessed=4 * (N * HW_128 * (C_in + C_out) + C_out * (C_in + 1)),
    )

    outs = pl.pallas_call(
        _make_heads_kernel(num_tasks),
        out_shape=out_shape,
        grid_spec=pltpu.PrefetchScalarGridSpec(
            num_scalar_prefetch=0,
            grid=grid,
            in_specs=in_specs,
            out_specs=out_specs,
        ),
        compiler_params=pltpu.CompilerParams(
            dimension_semantics=("parallel", "parallel")),
        cost_estimate=cost,
    )(*inputs)

    logits = {}
    for name, k, o in zip(names, n_cls, outs):
        if HW_128 != HW:
            o = o[:, :, :HW]           # only for ragged spatial sizes (<=127 pad pixels)
        logits[name] = o.reshape(N, k, H, W)
    return logits


def heads_reference(feature_maps, task_params):
    # Pure-JAX reference: each head is an einsum over channels + bias.
    out = {}
    for name, (w, b) in task_params.items():
        w_mat = w.reshape(w.shape[0], w.shape[1])                   # (num_classes, C_in)
        y = jnp.einsum("nchw,oc->nohw", feature_maps, w_mat) + b[None, :, None, None]
        out[name] = y.astype(feature_maps.dtype)
    return out


if __name__ == "__main__":
    key = jax.random.PRNGKey(0)
    k_x, k_wa, k_ba, k_wb, k_bb = jax.random.split(key, 5)

    # Small shapes consistent with the module: decoder feature map (N, C_dec, H, W)
    # and two segmentation tasks with 3 and 5 classes.
    N, C_in, H, W = 2, 4, 16, 16
    num_class_per_task = {"task_a": 3, "task_b": 5}

    x = jax.random.normal(k_x, (N, C_in, H, W), dtype=jnp.float32)

    bound = 1.0 / (C_in ** 0.5)   # nn.Conv2d(kernel_size=1) default init bound
    task_params = {
        "task_a": (
            jax.random.uniform(k_wa, (num_class_per_task["task_a"], C_in, 1, 1),
                               minval=-bound, maxval=bound, dtype=jnp.float32),
            jax.random.uniform(k_ba, (num_class_per_task["task_a"],),
                               minval=-bound, maxval=bound, dtype=jnp.float32),
        ),
        "task_b": (
            jax.random.uniform(k_wb, (num_class_per_task["task_b"], C_in, 1, 1),
                               minval=-bound, maxval=bound, dtype=jnp.float32),
            jax.random.uniform(k_bb, (num_class_per_task["task_b"],),
                               minval=-bound, maxval=bound, dtype=jnp.float32),
        ),
    }

    logits = joint_segmentation_heads(x, task_params)
    logits = jax.block_until_ready(logits)

    ref = heads_reference(x, task_params)
    for name, n_classes in num_class_per_task.items():
        assert logits[name].shape == (N, n_classes, H, W), (name, logits[name].shape)
        assert jnp.allclose(logits[name], ref[name], atol=1e-5, rtol=1e-5), f"mismatch: {name}"

    print("KERNEL_OK")
</pallas_src>

<mosaic_0001>
module attributes {stable_mosaic.version = 11 : i64} {
  func.func @kernel(%arg0: i32, %arg1: i32, %arg2: memref<1x4x128xf32, #tpu.memory_space<vmem>>, %arg3: memref<3x4xf32, #tpu.memory_space<vmem>>, %arg4: memref<3x1xf32, #tpu.memory_space<vmem>>, %arg5: memref<5x4xf32, #tpu.memory_space<vmem>>, %arg6: memref<5x1xf32, #tpu.memory_space<vmem>>, %arg7: memref<1x3x128xf32, #tpu.memory_space<vmem>>, %arg8: memref<1x5x128xf32, #tpu.memory_space<vmem>>) attributes {dimension_semantics = [#tpu.dimension_semantics<parallel>, #tpu.dimension_semantics<parallel>], iteration_bounds = array<i64: 2, 2>, scalar_prefetch = 0 : i64, scratch_operands = 0 : i64, tpu.core_type = #tpu.core_type<tc>, window_params = [{transform_indices = @transform_0, window_bounds = array<i64: 1, 4, 128>}, {pipeline_mode = #tpu.pipeline_mode<synchronous>, transform_indices = @transform_1, window_bounds = array<i64: 3, 4>}, {pipeline_mode = #tpu.pipeline_mode<synchronous>, transform_indices = @transform_2, window_bounds = array<i64: 3, 1>}, {pipeline_mode = #tpu.pipeline_mode<synchronous>, transform_indices = @transform_3, window_bounds = array<i64: 5, 4>}, {pipeline_mode = #tpu.pipeline_mode<synchronous>, transform_indices = @transform_4, window_bounds = array<i64: 5, 1>}, {transform_indices = @transform_5, window_bounds = array<i64: 1, 3, 128>}, {transform_indices = @transform_6, window_bounds = array<i64: 1, 5, 128>}]} {
    %c0 = arith.constant 0 : index
    %c0_0 = arith.constant 0 : index
    %c0_1 = arith.constant 0 : index
    %0 = vector.load %arg2[%c0, %c0_0, %c0_1] : memref<1x4x128xf32, #tpu.memory_space<vmem>>, vector<1x4x128xf32>
    %1 = vector.shape_cast %0 : vector<1x4x128xf32> to vector<4x128xf32>
    %c0_2 = arith.constant 0 : index
    %c0_3 = arith.constant 0 : index
    %2 = vector.load %arg3[%c0_2, %c0_3] : memref<3x4xf32, #tpu.memory_space<vmem>>, vector<3x4xf32>
    %cst = arith.constant dense<0.000000e+00> : vector<3x128xf32>
    %3 = tpu.matmul %2, %1, %cst {dimension_numbers = #tpu.dot_dimension_numbers<[1], [0], [0], [1], [0, 0, 1, 1], [], []>} : vector<3x4xf32>, vector<4x128xf32>, vector<3x128xf32> -> vector<3x128xf32>
    %c0_4 = arith.constant 0 : index
    %c0_5 = arith.constant 0 : index
    %4 = vector.load %arg4[%c0_4, %c0_5] : memref<3x1xf32, #tpu.memory_space<vmem>>, vector<3x1xf32>
    %5 = vector.broadcast %4 : vector<3x1xf32> to vector<3x128xf32>
    %6 = arith.addf %3, %5 : vector<3x128xf32>
    %c0_6 = arith.constant 0 : index
    %c0_7 = arith.constant 0 : index
    %c0_8 = arith.constant 0 : index
    %7 = vector.load %arg7[%c0_6, %c0_7, %c0_8] : memref<1x3x128xf32, #tpu.memory_space<vmem>>, vector<1x3x128xf32>
    %8 = vector.shape_cast %7 : vector<1x3x128xf32> to vector<3x128xf32>
    %9 = vector.shape_cast %6 : vector<3x128xf32> to vector<1x3x128xf32>
    tpu.vector_store %arg7[%c0_6, %c0_7, %c0_8], %9 {strides = array<i32>} : memref<1x3x128xf32, #tpu.memory_space<vmem>>, vector<1x3x128xf32>,
    %c0_9 = arith.constant 0 : index
    %c0_10 = arith.constant 0 : index
    %10 = vector.load %arg5[%c0_9, %c0_10] : memref<5x4xf32, #tpu.memory_space<vmem>>, vector<5x4xf32>
    %cst_11 = arith.constant dense<0.000000e+00> : vector<5x128xf32>
    %11 = tpu.matmul %10, %1, %cst_11 {dimension_numbers = #tpu.dot_dimension_numbers<[1], [0], [0], [1], [0, 0, 1, 1], [], []>} : vector<5x4xf32>, vector<4x128xf32>, vector<5x128xf32> -> vector<5x128xf32>
    %c0_12 = arith.constant 0 : index
    %c0_13 = arith.constant 0 : index
    %12 = vector.load %arg6[%c0_12, %c0_13] : memref<5x1xf32, #tpu.memory_space<vmem>>, vector<5x1xf32>
    %13 = vector.broadcast %12 : vector<5x1xf32> to vector<5x128xf32>
    %14 = arith.addf %11, %13 : vector<5x128xf32>
    %c0_14 = arith.constant 0 : index
    %c0_15 = arith.constant 0 : index
    %c0_16 = arith.constant 0 : index
    %15 = vector.load %arg8[%c0_14, %c0_15, %c0_16] : memref<1x5x128xf32, #tpu.memory_space<vmem>>, vector<1x5x128xf32>
    %16 = vector.shape_cast %15 : vector<1x5x128xf32> to vector<5x128xf32>
    %17 = vector.shape_cast %14 : vector<5x128xf32> to vector<1x5x128xf32>
    tpu.vector_store %arg8[%c0_14, %c0_15, %c0_16], %17 {strides = array<i32>} : memref<1x5x128xf32, #tpu.memory_space<vmem>>, vector<1x5x128xf32>,
    return
  }
  func.func @transform_0(%arg0: i32, %arg1: i32) -> (i32, i32, i32) {
    %c0_i32 = arith.constant 0 : i32
    %c0_i32_0 = arith.constant 0 : i32
    return %arg0, %c0_i32, %arg1 : i32, i32, i32
  }
  func.func @transform_1(%arg0: i32, %arg1: i32) -> (i32, i32) {
    %c0_i32 = arith.constant 0 : i32
    %c0_i32_0 = arith.constant 0 : i32
    %c0_i32_1 = arith.constant 0 : i32
    return %c0_i32, %c0_i32_0 : i32, i32
  }
  func.func @transform_2(%arg0: i32, %arg1: i32) -> (i32, i32) {
    %c0_i32 = arith.constant 0 : i32
    %c0_i32_0 = arith.constant 0 : i32
    %c0_i32_1 = arith.constant 0 : i32
    return %c0_i32, %c0_i32_0 : i32, i32
  }
  func.func @transform_3(%arg0: i32, %arg1: i32) -> (i32, i32) {
    %c0_i32 = arith.constant 0 : i32
    %c0_i32_0 = arith.constant 0 : i32
    %c0_i32_1 = arith.constant 0 : i32
    return %c0_i32, %c0_i32_0 : i32, i32
  }
  func.func @transform_4(%arg0: i32, %arg1: i32) -> (i32, i32) {
    %c0_i32 = arith.constant 0 : i32
    %c0_i32_0 = arith.constant 0 : i32
    %c0_i32_1 = arith.constant 0 : i32
    return %c0_i32, %c0_i32_0 : i32, i32
  }
  func.func @transform_5(%arg0: i32, %arg1: i32) -> (i32, i32, i32) {
    %c0_i32 = arith.constant 0 : i32
    %c0_i32_0 = arith.constant 0 : i32
    return %arg0, %c0_i32, %arg1 : i32, i32, i32
  }
  func.func @transform_6(%arg0: i32, %arg1: i32) -> (i32, i32, i32) {
    %c0_i32 = arith.constant 0 : i32
    %c0_i32_0 = arith.constant 0 : i32
    return %arg0, %c0_i32, %arg1 : i32, i32, i32
  }
}

</mosaic_0001>

<bundles_post_ra>
// kernel: tpu_custom_call.1
= control target key start
LH: loop header
LB: loop body
LE: loop exit
PB: predicated region body
PF: predicated region fallthrough
CT: control target
= control target key end

     0   :  { %s758_s21 = smov 0   ;;  %s760_s22 = smov 0   ;;  %s824_s0 = inlined_call_operand.vmem [shape: f32[2,4,256], index: 0, kind: input, shape index: {}]   ;;  %s825_s1 = inlined_call_operand.vmem [shape: f32[3,4], index: 1, kind: input, shape index: {}]   ;;  %s826_s2 = inlined_call_operand.vmem [shape: f32[3,1], index: 2, kind: input, shape index: {}]   ;;  %s827_s3 = inlined_call_operand.vmem [shape: f32[5,4], index: 3, kind: input, shape index: {}]   ;;  %s828_s4 = inlined_call_operand.vmem [shape: f32[5,1], index: 4, kind: input, shape index: {}]   ;;  %s829_s5 = inlined_call_operand.vmem [shape: f32[2,3,256], index: 5, kind: output, shape index: {0}]   ;;  %s830_s6 = inlined_call_operand.vmem [shape: f32[2,5,256], index: 6, kind: output, shape index: {1}]  }
   0x1   :  { %s762_s23 = smov 0   ;;  %s764_s24 = smov 0  }
   0x2   :  { %s766_s25 = smov 0  }
   0x3 LB: > { %s26_s26 = sadd.s32 1, %s710_s23  ;;  %s29_s27 = sadd.s32 1, %s714_s24  ;;  %s718_s25 = sphi %s766_s25, %s17_s25   ;;  %s714_s24 = sphi %s764_s24, %s834_s24   ;;  %s710_s23 = sphi %s762_s23, %s833_s23   ;;  %s706_s22 = sphi %s760_s22, %s832_s22   ;;  %s702_s21 = sphi %s758_s21, %s831_s21  }
   0x4   : > { %p27_p0 = scmp.ge.s32.totalorder %s26_s26, 2  ;;  %p609_p1 = scmp.ge.s32.totalorder %s718_s25, 1 }
   0x5   : > { %p236_p2 = scmp.lt.s32.totalorder %s718_s25, 5 }
   0x6   : > { %s836_s26 = smov (%p27_p0, %s26_s26), 0  ;;  %s838_s27 = smov (!%p27_p0, %s29_s27), %s714_s24 }
   0x7   : > { %p237_p3 = pnand %p609_p1, %p236_p2  ;;  %p31_p4 = scmp.ge.s32.totalorder %s838_s27, 2 }
   0x8   : > { %p280_p5 = scmp.lt.s32.totalorder (!%p237_p3), %s706_s22, 1  ;;  %p282_p6 = scmp.lt.s32.totalorder (!%p237_p3), %s702_s21, 1  ;;  %v720_v0 = vmov (!%p237_p3), 0.0   ;;  %vm721_vm0 = vmmov (!%p237_p3), 0   ;;  %v306_v1 = vld [vmem:[%s826_s2] sm:$0x7] (!%p237_p3) }
   0x9   : > { %s840_s27 = smov (%p31_p4, %s838_s27), 0  ;;  %240 = sbr.rel (%p237_p3) target bundleno = 238 (0xee), region = 40 }
   0xa   : > { %626 = vmatprep.subr.mxu0 (!%p237_p3), %v720_v0  ;;  %631 = vmatprep.subr.mxu1 (!%p237_p3), %v720_v0  ;;  %v722_v2 = vmov (!%p237_p3), 0   ;;  %v392_v3 = vld [vmem:[%s828_s4] sm:$0x1f] (!%p237_p3)  ;;  %vm316_vm1 = vcmask (!%p237_p3), 1043456   ;;  %vm312_vm2 = vcmask (!%p237_p3), 31744  }
   0xb   : > { %628 = vmatprep.mubr.msk.f32.mxu0 (!%p237_p3), %vm721_vm0, %v720_v0  ;;  %633 = vmatprep.mubr.msk.f32.mxu1 (!%p237_p3), %vm721_vm0, %v720_v0  ;;  %v305_v4 = vld [vmem:[%s825_s1] sm:$0x7] (!%p237_p3) }
   0xc   : > { %679 = vset.pattern.permute.xlu0 (!%p237_p3), %v722_v2  ;;  %v391_v5 = vld [vmem:[%s827_s3] sm:$0x1f] (!%p237_p3) }
   0xd   : > { %309 = vperm.xlu0 (!%p237_p3), %679, %v306_v1  }
  0x10   : > { %s842_s22 = smov (!%p280_p5, %s706_s22), 1  ;;  %s844_s21 = smov (!%p282_p6, %s702_s21), 1 }
  0x11   : > { %s610_s30 = sshll.u32 %s842_s22, 1  ;;  %395 = vperm.xlu0 %679, %v392_v3  }
  0x12   : > { %s285_s7 = sadd.s32 %s610_s30, %s844_s21 }
  0x13   : > { %s611_s10 = sshll.u32 %s285_s7, 2  ;;  %s615_s18 = sshll.u32 %s285_s7, 3 }
  0x14   : > { %s287_s13 = scalar_lea.vmem %s824_s0, %s611_s10  ;;  %s295_s21 = scalar_lea.vmem %s829_s5, %s611_s10 }
  0x15   : > { %v304_v6 = vld [vmem:[%s287_s13] sm:$0xf]  ;;  %s303_s29 = scalar_lea.vmem %s830_s6, %s615_s18 }
  0x16   : > { %627 = vmatpush3.msk.msra.mxu0 %vm316_vm1, %v304_v6  ;;  %632 = vmatpush3.msk.msra.mxu1 %vm316_vm1, %v304_v6 }
  0x17   : > { %629 = vmatmul.mubr.msk.f32.vlgmr.msra.gmra.mrb[0].mxu0 %vm312_vm2, %v305_v4  ;;  %634 = vmatmul.mubr.msk.f32.vlgmr.msra.gmra.mrb[0].mxu1 %vm312_vm2, %v391_v5 }
  0x8c   : > { %v310_v7 = vpop.permute.xlu0 %309 }
  0x90   : > { %v396_v8 = vpop.permute.xlu0 %395 }
  0xea   : > { %v386_v9 = vpop.f32.mrb[0].mxu0  ;;  %v467_v10 = vpop.f32.mrb[0].mxu1 }
  0xeb   : > { %v387_v11 = vadd.f32 %v386_v9, %v310_v7  ;;  %v468_v12 = vadd.f32 %v467_v10, %v396_v8  ;;  %v630_v13 = vpop.f32.mrb[1].mxu0  ;;  %v635_v14 = vpop.f32.mrb[1].mxu1 }
  0xed   : > { %390 = vst [vmem:[%s295_s21] sm:$0x7] %v387_v11  ;;  %471 = vst [vmem:[%s303_s29] sm:$0x1f] %v468_v12 }
  0xee PF: > { %s17_s25 = sadd.s32 1, %s718_s25   ;;  %s831_s21 = smov %s710_s23 }
  0xef   : > { %p14_p7 = scmp.ge.s32.totalorder %s17_s25, 6   ;;  %s832_s22 = smov %s714_s24 }
  0xf0   : > { %s833_s23 = smov %s836_s26  ;;  %s834_s24 = smov %s840_s27 }
  0xf1   :  { %16 = sbr.rel (!%p14_p7) target bundleno = 3 (0x3), region = 82 }

</bundles_post_ra>
